<compile_context>
chip_gen: v7x
topology: tpu7x:2x2x1
jax: 0.10.0
libtpu: 0.0.40
codegen_flags: <defaults>
</compile_context>

<pallas_src>
from collections import namedtuple
from typing import List

import jax
import jax.numpy as jnp
from jax.experimental import pallas as pl
from jax.experimental.pallas import tpu as pltpu


# ----------------------------------------------------------------------------
# Pallas kernel: fused 1x1 conv (W @ x) + bias + SiLU over lane-dense HW tiles.
# ----------------------------------------------------------------------------
def _pointwise_conv_silu_kernel(x_ref, w_ref, b_ref, o_ref):
    # x_ref: (Cin, T)   w_ref: (Cout, Cin)   b_ref: (Cout, 1)   o_ref: (Cout, T)
    x = x_ref[...]                                   # f32, HW on the lane axis
    w = w_ref[...]                                   # tiny, resident every step
    cin = w.shape[1]

    # Channel counts are tiny (Cin=4, Cout=8) -> skip the MXU entirely;
    # unrolled VPU broadcast multiply-adds.  Bias is folded into the first MAC.
    acc = w[:, 0:1] * x[0:1, :] + b_ref[...]         # (Cout, T) f32
    for ci in range(1, cin):
        acc = acc + w[:, ci:ci + 1] * x[ci:ci + 1, :]

    # SiLU = x * sigmoid(x).  exp -> EUP slot; explicit reciprocal for the
    # denominator (approx=False keeps full f32 accuracy; use approx=True on
    # v5e if the consumer tolerates ~1e-3 relative error).
    sig = pl.reciprocal(1.0 + jnp.exp(-acc), approx=False)
    o_ref[...] = (acc * sig).astype(o_ref.dtype)


def _round_up(v: int, m: int) -> int:
    return ((v + m - 1) // m) * m


def _choose_tile_hw(n: int, hw: int, max_tile_hw: int) -> int:
    """Largest lane tile (multiple of 128, <= max_tile_hw) covering HW in as
    few grid steps as possible, while keeping >= 2 parallel grid steps when
    batch == 1 so v7x can use both TensorCores."""
    hw_pad = _round_up(hw, 128)
    tile = min(max_tile_hw, hw_pad)
    if n == 1 and hw_pad > 128:
        tile = min(tile, _round_up(pl.cdiv(hw_pad, 2), 128))
    return tile


def pointwise_conv_silu_nchw(x_nchw: jax.Array, w_oc_ic: jax.Array,
                             b_oc1: jax.Array, *, max_tile_hw: int = 2048
                             ) -> jax.Array:
    """1x1 conv + bias + SiLU, NCHW in / NCHW out, no transposes, no padding.

    x_nchw: (N, Cin, H, W) f32; w_oc_ic: (Cout, Cin); b_oc1: (Cout, 1).
    """
    n, cin, h, w = x_nchw.shape
    cout = w_oc_ic.shape[0]
    hw = h * w

    # Free reshape: channels stay on the sublane axis, H*W on the lane axis.
    x3 = x_nchw.reshape(n, cin, hw)

    tile_hw = _choose_tile_hw(n, hw, max_tile_hw)
    grid = (n, pl.cdiv(hw, tile_hw))     # ragged last HW block handled by Pallas

    # Working set per step is ~(Cin+2*Cout)*tile*4 B (<~160 KiB at tile=2048),
    # far below the VMEM limit on every generation -> no vmem_limit override.
    cost = pl.CostEstimate(
        flops=2 * n * hw * cin * cout,
        transcendentals=n * hw * cout,
        bytes_accessed=4 * (n * cin * hw + cin * cout + cout + n * cout * hw),
    )

    out3 = pl.pallas_call(
        _pointwise_conv_silu_kernel,
        out_shape=jax.ShapeDtypeStruct((n, cout, hw), jnp.float32),
        grid_spec=pl.GridSpec(
            grid=grid,
            in_specs=[
                # batch dim squeezed out of the kernel view (None == Squeezed)
                pl.BlockSpec((None, cin, tile_hw), lambda b, j: (b, 0, j)),
                pl.BlockSpec((cout, cin), lambda b, j: (0, 0)),
                pl.BlockSpec((cout, 1), lambda b, j: (0, 0)),
            ],
            out_specs=pl.BlockSpec((None, cout, tile_hw),
                                   lambda b, j: (b, 0, j)),
        ),
        compiler_params=pltpu.CompilerParams(
            dimension_semantics=("parallel", "parallel")),
        cost_estimate=cost,
    )(x3, w_oc_ic, b_oc1)

    return out3.reshape(n, cout, h, w)


# ----------------------------------------------------------------------------
# Synthetic "ONNX session": deterministic 1x1 conv + bias + SiLU graph.
# ----------------------------------------------------------------------------
class _SyntheticSession:
    def __init__(self, c_in: int, c_out: int, static_input_shape):
        # Deterministic parameter init (this replaces loading an .onnx file).
        kw, kb = jax.random.split(jax.random.PRNGKey(0))
        self.weight = (jax.random.normal(kw, (c_out, c_in), jnp.float32)
                       * (1.0 / jnp.sqrt(c_in)))          # (Cout, Cin)
        self.bias = jax.random.normal(kb, (c_out, 1), jnp.float32) * 0.1
        self.c_in = c_in
        self.c_out = c_out
        self._in_shape = tuple(static_input_shape)          # NCHW
        n, _, h, w = self._in_shape
        self._out_shape = (n, c_out, h, w)                  # NCHW

    def get_inputs(self):
        Binding = namedtuple("Binding", ("name", "type", "shape"))
        return [Binding("images", "tensor(float)", self._in_shape)]

    def get_outputs(self):
        Binding = namedtuple("Binding", ("name", "type", "shape"))
        return [Binding("output", "tensor(float)", self._out_shape)]

    def run(self, output_names, feed_dict):
        (x,) = feed_dict.values()              # NCHW float32
        y = pointwise_conv_silu_nchw(x, self.weight, self.bias)
        return [y]                              # one output, NCHW


# ----------------------------------------------------------------------------
# ORTWrapper with the same forward() semantics as the PyTorch module.
# ----------------------------------------------------------------------------
class ORTWrapper:
    def __init__(self, c_in: int = 4, c_out: int = 8,
                 static_input_shape=(2, 4, 16, 16)):
        self.session = _SyntheticSession(c_in, c_out, static_input_shape)
        self.__init_bindings()

    def __init_bindings(self):
        Binding = namedtuple("Binding", ("name", "dtype", "shape"))
        inputs_info = []
        outputs_info = []
        self.is_dynamic = False
        for tensor in self.session.get_inputs():
            if any(not isinstance(d, int) for d in tensor.shape):
                self.is_dynamic = True
            inputs_info.append(Binding(tensor.name, tensor.type,
                                       tuple(tensor.shape)))
        for tensor in self.session.get_outputs():
            outputs_info.append(Binding(tensor.name, tensor.type,
                                        tuple(tensor.shape)))
        self.inputs_info = inputs_info
        self.outputs_info = outputs_info
        self.num_inputs = len(inputs_info)

    def __call__(self, *inputs):
        return self.forward(*inputs)

    def forward(self, *inputs):
        assert len(inputs) == self.num_inputs
        contiguous_inputs: List[jax.Array] = [
            jnp.asarray(i, dtype=jnp.float32) for i in inputs
        ]
        if not self.is_dynamic:
            for i in range(self.num_inputs):
                assert contiguous_inputs[i].shape == self.inputs_info[i].shape
        outputs = self.session.run(
            [o.name for o in self.outputs_info],
            {j.name: contiguous_inputs[i]
             for i, j in enumerate(self.inputs_info)},
        )
        OutputType = namedtuple(
            "OutputType",
            tuple(
                o.name.replace(":", "_")
                if not o.name[0].isdigit() and o.name[0] != "_"
                else "name_" + o.name
                for o in self.outputs_info
            ),
        )
        return OutputType(*outputs)


# ----------------------------------------------------------------------------
# Reference check in plain JAX.
# ----------------------------------------------------------------------------
def _reference(x, w_oc_ic, b_oc1):
    y = jnp.einsum("nchw,oc->nohw", x, w_oc_ic) + b_oc1.reshape(1, -1, 1, 1)
    return y * jax.nn.sigmoid(y)


if __name__ == "__main__":
    key = jax.random.PRNGKey(0)

    # Primary check: the wrapper at its static input shape (hw = 256).
    x = jax.random.normal(key, (2, 4, 16, 16), jnp.float32)   # NCHW
    model = ORTWrapper(c_in=4, c_out=8, static_input_shape=(2, 4, 16, 16))
    out = model(x)
    y = jax.block_until_ready(out.output)

    ref = _reference(x, model.session.weight, model.session.bias)
    assert y.shape == (2, 8, 16, 16), y.shape
    assert jnp.allclose(y, ref, atol=2e-5, rtol=2e-5), "mismatch vs reference"

    # Ragged-HW coverage: 20x20 (hw=400) and 40x40 (hw=1600) detector heads,
    # batch=1 (exercises the partial last block + the >=2-step v7x guarantee).
    for shape in ((1, 4, 20, 20), (1, 4, 40, 40)):
        key, sub = jax.random.split(key)
        xr = jax.random.normal(sub, shape, jnp.float32)
        yr = jax.block_until_ready(
            pointwise_conv_silu_nchw(xr, model.session.weight,
                                     model.session.bias))
        rr = _reference(xr, model.session.weight, model.session.bias)
        assert yr.shape == (shape[0], 8, shape[2], shape[3]), yr.shape
        assert jnp.allclose(yr, rr, atol=2e-5, rtol=2e-5), f"mismatch {shape}"

    print("KERNEL_OK")
</pallas_src>

<mosaic_0001>
module attributes {stable_mosaic.version = 11 : i64} {
  func.func @_pointwise_conv_silu_kernel(%arg0: i32, %arg1: i32, %arg2: memref<1x4x256xf32, #tpu.memory_space<vmem>>, %arg3: memref<8x4xf32, #tpu.memory_space<vmem>>, %arg4: memref<8x1xf32, #tpu.memory_space<vmem>>, %arg5: memref<1x8x256xf32, #tpu.memory_space<vmem>>) attributes {dimension_semantics = [#tpu.dimension_semantics<parallel>, #tpu.dimension_semantics<parallel>], iteration_bounds = array<i64: 2, 1>, scalar_prefetch = 0 : i64, scratch_operands = 0 : i64, tpu.core_type = #tpu.core_type<tc>, window_params = [{transform_indices = @transform_0, window_bounds = array<i64: 1, 4, 256>}, {pipeline_mode = #tpu.pipeline_mode<synchronous>, transform_indices = @transform_1, window_bounds = array<i64: 8, 4>}, {pipeline_mode = #tpu.pipeline_mode<synchronous>, transform_indices = @transform_2, window_bounds = array<i64: 8, 1>}, {transform_indices = @transform_3, window_bounds = array<i64: 1, 8, 256>}]} {
    %c0 = arith.constant 0 : index
    %c0_0 = arith.constant 0 : index
    %c0_1 = arith.constant 0 : index
    %0 = vector.load %arg2[%c0, %c0_0, %c0_1] : memref<1x4x256xf32, #tpu.memory_space<vmem>>, vector<1x4x256xf32>
    %1 = vector.shape_cast %0 : vector<1x4x256xf32> to vector<4x256xf32>
    %c0_2 = arith.constant 0 : index
    %c0_3 = arith.constant 0 : index
    %2 = vector.load %arg3[%c0_2, %c0_3] : memref<8x4xf32, #tpu.memory_space<vmem>>, vector<8x4xf32>
    %3 = vector.extract_strided_slice %2 {offsets = [0, 0], sizes = [8, 1], strides = [1, 1]} : vector<8x4xf32> to vector<8x1xf32>
    %4 = vector.extract_strided_slice %1 {offsets = [0, 0], sizes = [1, 256], strides = [1, 1]} : vector<4x256xf32> to vector<1x256xf32>
    %5 = vector.broadcast %3 : vector<8x1xf32> to vector<8x256xf32>
    %6 = vector.broadcast %4 : vector<1x256xf32> to vector<8x256xf32>
    %7 = arith.mulf %5, %6 : vector<8x256xf32>
    %c0_4 = arith.constant 0 : index
    %c0_5 = arith.constant 0 : index
    %8 = vector.load %arg4[%c0_4, %c0_5] : memref<8x1xf32, #tpu.memory_space<vmem>>, vector<8x1xf32>
    %9 = vector.broadcast %8 : vector<8x1xf32> to vector<8x256xf32>
    %10 = arith.addf %7, %9 : vector<8x256xf32>
    %11 = vector.extract_strided_slice %2 {offsets = [0, 1], sizes = [8, 1], strides = [1, 1]} : vector<8x4xf32> to vector<8x1xf32>
    %12 = vector.extract_strided_slice %1 {offsets = [1, 0], sizes = [1, 256], strides = [1, 1]} : vector<4x256xf32> to vector<1x256xf32>
    %13 = vector.broadcast %11 : vector<8x1xf32> to vector<8x256xf32>
    %14 = vector.broadcast %12 : vector<1x256xf32> to vector<8x256xf32>
    %15 = arith.mulf %13, %14 : vector<8x256xf32>
    %16 = arith.addf %10, %15 : vector<8x256xf32>
    %17 = vector.extract_strided_slice %2 {offsets = [0, 2], sizes = [8, 1], strides = [1, 1]} : vector<8x4xf32> to vector<8x1xf32>
    %18 = vector.extract_strided_slice %1 {offsets = [2, 0], sizes = [1, 256], strides = [1, 1]} : vector<4x256xf32> to vector<1x256xf32>
    %19 = vector.broadcast %17 : vector<8x1xf32> to vector<8x256xf32>
    %20 = vector.broadcast %18 : vector<1x256xf32> to vector<8x256xf32>
    %21 = arith.mulf %19, %20 : vector<8x256xf32>
    %22 = arith.addf %16, %21 : vector<8x256xf32>
    %23 = vector.extract_strided_slice %2 {offsets = [0, 3], sizes = [8, 1], strides = [1, 1]} : vector<8x4xf32> to vector<8x1xf32>
    %24 = vector.extract_strided_slice %1 {offsets = [3, 0], sizes = [1, 256], strides = [1, 1]} : vector<4x256xf32> to vector<1x256xf32>
    %25 = vector.broadcast %23 : vector<8x1xf32> to vector<8x256xf32>
    %26 = vector.broadcast %24 : vector<1x256xf32> to vector<8x256xf32>
    %27 = arith.mulf %25, %26 : vector<8x256xf32>
    %28 = arith.addf %22, %27 : vector<8x256xf32>
    %cst = arith.constant 0.000000e+00 : f32
    %29 = vector.broadcast %cst : f32 to vector<8x256xf32>
    %30 = arith.subf %29, %28 : vector<8x256xf32>
    %31 = math.exp %30 : vector<8x256xf32>
    %cst_6 = arith.constant 1.000000e+00 : f32
    %32 = vector.broadcast %cst_6 : f32 to vector<8x256xf32>
    %33 = arith.addf %32, %31 : vector<8x256xf32>
    %34 = tpu.reciprocal %33 : vector<8x256xf32> -> vector<8x256xf32>
    %35 = arith.mulf %28, %34 : vector<8x256xf32>
    %c0_7 = arith.constant 0 : index
    %c0_8 = arith.constant 0 : index
    %c0_9 = arith.constant 0 : index
    %36 = vector.load %arg5[%c0_7, %c0_8, %c0_9] : memref<1x8x256xf32, #tpu.memory_space<vmem>>, vector<1x8x256xf32>
    %37 = vector.shape_cast %36 : vector<1x8x256xf32> to vector<8x256xf32>
    %38 = vector.shape_cast %35 : vector<8x256xf32> to vector<1x8x256xf32>
    tpu.vector_store %arg5[%c0_7, %c0_8, %c0_9], %38 {strides = array<i32>} : memref<1x8x256xf32, #tpu.memory_space<vmem>>, vector<1x8x256xf32>,
    return
  }
  func.func @transform_0(%arg0: i32, %arg1: i32) -> (i32, i32, i32) {
    %c0_i32 = arith.constant 0 : i32
    %c0_i32_0 = arith.constant 0 : i32
    return %arg0, %c0_i32, %arg1 : i32, i32, i32
  }
  func.func @transform_1(%arg0: i32, %arg1: i32) -> (i32, i32) {
    %c0_i32 = arith.constant 0 : i32
    %c0_i32_0 = arith.constant 0 : i32
    %c0_i32_1 = arith.constant 0 : i32
    return %c0_i32, %c0_i32_0 : i32, i32
  }
  func.func @transform_2(%arg0: i32, %arg1: i32) -> (i32, i32) {
    %c0_i32 = arith.constant 0 : i32
    %c0_i32_0 = arith.constant 0 : i32
    %c0_i32_1 = arith.constant 0 : i32
    return %c0_i32, %c0_i32_0 : i32, i32
  }
  func.func @transform_3(%arg0: i32, %arg1: i32) -> (i32, i32, i32) {
    %c0_i32 = arith.constant 0 : i32
    %c0_i32_0 = arith.constant 0 : i32
    return %arg0, %c0_i32, %arg1 : i32, i32, i32
  }
}

</mosaic_0001>

<bundles_post_ra>
// kernel: tpu_custom_call.1
= control target key start
LH: loop header
LB: loop body
LE: loop exit
PB: predicated region body
PF: predicated region fallthrough
CT: control target
= control target key end

     0   :  { %8 = vsyncpa [#allocation3], 0  ;;  %s730_s0 = inlined_call_operand.vmem [shape: f32[2,4,256], index: 0, kind: input, shape index: {}]   ;;  %s731_s1 = inlined_call_operand.vmem [shape: f32[8,4], index: 1, kind: input, shape index: {}]   ;;  %s732_s2 = inlined_call_operand.vmem [shape: f32[8,1], index: 2, kind: input, shape index: {}]   ;;  %s733_s3 = inlined_call_operand.hbm [shape: f32[2,8,256], index: 3, kind: output, shape index: {}]  }
   0x1   :  { %10 = vsyncpa [#allocation3 + $0x1], 0  ;;  %s612_s12 = smov 0   ;;  %s614_s13 = smov 0  }
   0x2   :  { %s616_s14 = smov 0   ;;  %s618_s15 = smov 0  }
   0x3   :  { %s620_s16 = smov 0   ;;  %s622_s17 = smov 0  }
   0x4 LB: > { %s421_s18 = sadd.s32 4294967295, %s585_s17   ;;  %s422_s19 = sadd.s32 4294967294, %s585_s17   ;;  %s585_s17 = sphi %s622_s17, %s16_s17   ;;  %s581_s16 = sphi %s620_s16, %s740_s16   ;;  %s577_s15 = sphi %s618_s15, %s739_s15   ;;  %s573_s14 = sphi %s616_s14, %s738_s14   ;;  %s569_s13 = sphi %s614_s13, %s737_s13   ;;  %s565_s12 = sphi %s612_s12, %s736_s12  }
   0x5   : > { %s28_s20 = sadd.s32 1, %s581_s16  ;;  %s107_s21 = sadd.s32 1, %s573_s14 }
   0x6   : > { %p30_p0 = scmp.ge.s32.totalorder %s28_s20, 2  ;;  %p117_p1 = scmp.ne.s32.totalorder %s573_s14, %s569_s13 }
   0x7   : > { %p118_p2 = scmp.eq.s32.totalorder %s421_s18, 1  ;;  %p123_p3 = scmp.ne.s32.totalorder %s569_s13, %s565_s12 }
   0x8   : > { %s742_s20 = smov (%p30_p0, %s28_s20), 0  ;;  %p124_p5 = scmp.eq.s32.totalorder %s422_s19, 1 }
   0x9   : > { %p652_p4 = por %p118_p2, %p117_p1  ;;  %s102_s23 = ssub.s32 %s581_s16, %s742_s20 }
   0xa   : > { %p425_p6 = scmp.ge.s32.totalorder %s585_s17, 1  ;;  %p105_p7 = scmp.eq.s32.totalorder %s102_s23, 0 }
   0xb   : > { %p659_p8 = por %p124_p5, %p123_p3  ;;  %p161_p9 = scmp.lt.s32.totalorder %s585_s17, 3 }
   0xc   : > { %s665_s25 = scalar_select %p105_p7, %s573_s14, %s107_s21  }
   0xd   : > { %p162_p10 = pnand %p425_p6, %p161_p9 }
   0xe   : > { %v201_v0 = vld [vmem:[%s731_s1] sm:$0xff] (!%p162_p10)  ;;  %v587_v1 = vmov (!%p162_p10), 0   ;;  %v588_v2 = vmov (!%p162_p10), 1   ;;  %v589_v4 = vmov (!%p162_p10), 2   ;;  %v590_v5 = vmov (!%p162_p10), 3   ;;  %p190_p11 = scmp.lt.s32.totalorder (!%p162_p10), %s577_s15, 1 }
   0xf   : > { %165 = sbr.rel (%p162_p10) target bundleno = 202 (0xca), region = 32  ;;  %495 = vset.pattern.permute.xlu0 (!%p162_p10), %v587_v1  ;;  %496 = vset.pattern.permute.xlu1 (!%p162_p10), %v588_v2  ;;  %v228_v3 = vld [vmem:[%s732_s2] sm:$0xff] (!%p162_p10)  ;;  %v208_v6 = vlaneseq (!%p162_p10)  ;;  %s186_s8 = sand.u32 (!%p162_p10), 1, %s569_s13  }
  0x10   : > { %204 = vperm.xlu0 (!%p162_p10), %495, %v201_v0   ;;  %237 = vperm.xlu1 (!%p162_p10), %496, %v201_v0   ;;  %s426_s9 = sshll.u32 (!%p162_p10), %s186_s8, 4  ;;  %s435_s10 = sshll.u32 (!%p162_p10), %s577_s15, 8 }
  0x11   : > { %v209_v7 = vshrl.u32 (!%p162_p10), %v208_v6, 7  ;;  %s188_s11 = scalar_lea.vmem (!%p162_p10), [#allocation2], %s426_s9  ;;  %s683_s23 = scalar_lea.hbm (!%p162_p10), %s733_s3, %s435_s10 }
  0x12   : > { %s345_s18 = sshll.u32 (!%p162_p10), %s188_s11, 4  ;;  %s329_s26 = scalar_lea.sflag (!%p162_p10), [#allocation3], %s186_s8  ;;  %s685_s18 = int_to_ptr.vmem [resolvable:$true] %s345_s18 }
  0x13   : > { %v210_v8 = vsub.s32 (!%p162_p10), 0, %v209_v7  ;;  %v214_v9 = vsub.s32 (!%p162_p10), 4, %v209_v7  ;;  %v242_v11 = vsub.s32 (!%p162_p10), 1, %v209_v7  ;;  %v246_v12 = vsub.s32 (!%p162_p10), 5, %v209_v7  ;;  %s591_s27 = smov (!%p162_p10), [#allocation2]  }
  0x14   : > { %231 = vperm.xlu0 (!%p162_p10), %495, %v228_v3   ;;  %497 = vset.pattern.permute.xlu1 (!%p162_p10), %v589_v4  ;;  %v268_v13 = vsub.s32 (!%p162_p10), 2, %v209_v7  ;;  %v272_v14 = vsub.s32 (!%p162_p10), 6, %v209_v7  ;;  %v294_v21 = vsub.s32 (!%p162_p10), 3, %v209_v7  ;;  %v298_v22 = vsub.s32 (!%p162_p10), 7, %v209_v7  ;;  %s511_s28 = sshll.u32 (!%p162_p10), %s591_s27, 4  ;;  %s512_s28 = int_to_ptr.vmem [resolvable:$false] %s511_s28 }
  0x15   : > { %263 = vperm.xlu1 (!%p162_p10), %497, %v201_v0   ;;  %s513_s29 = scalar_lea.vmem (!%p162_p10), %s512_s28, 512  ;;  %p514_p1 = scmp.lt.s32.totalorder (!%p162_p10), %s685_s18, %s512_s28 }
  0x16   : > { %s191_s30 = scalar_select %p190_p11, %s577_s15, 1 }
  0x17   : > { %s507_s15 = scalar_lea.vmem %s685_s18, 256 }
  0x18   : > { %498 = vset.pattern.permute.xlu0 %v590_v5  ;;  %s434_s4 = sshll.u32 %s191_s30, 3  ;;  %p508_p12 = scmp.ne.s32.totalorder %s685_s18, %s507_s15 }
  0x19   : > { %289 = vperm.xlu0 %498, %v201_v0   ;;  %s197_s7 = scalar_lea.vmem %s730_s0, %s434_s4  ;;  %p515_p2 = scmp.lt.s32.totalorder %s513_s29, %s507_s15 }
  0x1a   : > { %v200_v10 = vld [vmem:[%s197_s7] sm:$0xff]  ;;  %p509_p13 = pnand %p508_p12, %p652_p4 }
  0x1b   : > { %v211_v15 = vrot.slane %v200_v10, %v210_v8  ;;  %v215_v16 = vrot.slane %v200_v10, %v214_v9  ;;  %v243_v17 = vrot.slane %v200_v10, %v242_v11  ;;  %v247_v18 = vrot.slane %v200_v10, %v246_v12  ;;  %p516_p3 = por %p515_p2, %p514_p1 }
  0x1c   : > { %v269_v19 = vrot.slane %v200_v10, %v268_v13  ;;  %v273_v20 = vrot.slane %v200_v10, %v272_v14  ;;  %v295_v31 = vrot.slane %v200_v10, %v294_v21  ;;  %v299_v32 = vrot.slane %v200_v10, %v298_v22  ;;  %p510_p0 = pneg %p509_p13 }
  0x1d   : > { %v221_v23 = vrot.slane %v211_v15, %v210_v8  ;;  %v225_v24 = vrot.slane %v215_v16, %v210_v8  ;;  %v253_v27 = vrot.slane %v243_v17, %v242_v11  ;;  %v257_v28 = vrot.slane %v247_v18, %v242_v11 }
  0x1e   : > { %v279_v29 = vrot.slane %v269_v19, %v268_v13  ;;  %v283_v30 = vrot.slane %v273_v20, %v268_v13  ;;  %v305_v43 = vrot.slane %v295_v31, %v294_v21  ;;  %v309_v44 = vrot.slane %v299_v32, %v294_v21  ;;  %p517_p5 = pnand %p516_p3, %p510_p0 }
  0x8f   : > { %v205_v25 = vpop.permute.xlu0 %204  ;;  %v238_v26 = vpop.permute.xlu1 %237 }
  0x90   : > { %v226_v33 = vmul.f32 %v221_v23, %v205_v25  ;;  %v227_v34 = vmul.f32 %v225_v24, %v205_v25  ;;  %v258_v36 = vmul.f32 %v253_v27, %v238_v26  ;;  %v259_v37 = vmul.f32 %v257_v28, %v238_v26 }
  0x93   : > { %v232_v35 = vpop.permute.xlu0 %231 }
  0x94   : > { %v234_v38 = vadd.f32 %v232_v35, %v226_v33  ;;  %v235_v39 = vadd.f32 %v232_v35, %v227_v34  ;;  %v264_v40 = vpop.permute.xlu1 %263 }
  0x95   : > { %v284_v41 = vmul.f32 %v279_v29, %v264_v40  ;;  %v285_v42 = vmul.f32 %v283_v30, %v264_v40 }
  0x96   : > { %v260_v45 = vadd.f32 %v258_v36, %v234_v38  ;;  %v261_v46 = vadd.f32 %v259_v37, %v235_v39 }
  0x98   : > { %v286_v47 = vadd.f32 %v284_v41, %v260_v45  ;;  %v287_v48 = vadd.f32 %v285_v42, %v261_v46  ;;  %v290_v49 = vpop.permute.xlu0 %289 }
  0x99   : > { %v310_v50 = vmul.f32 %v305_v43, %v290_v49  ;;  %v311_v51 = vmul.f32 %v309_v44, %v290_v49 }
  0x9b   : > { %v312_v52 = vadd.f32 %v310_v50, %v286_v47  ;;  %v313_v53 = vadd.f32 %v311_v51, %v287_v48 }
  0x9d   : > { %v314_v54 = vsub.f32 0.0, %v312_v52  ;;  %v315_v55 = vsub.f32 0.0, %v313_v53 }
  0x9f   : > { %v316_v56 = vmul.f32 1.442695, %v314_v54  ;;  %v318_v57 = vmul.f32 1.442695, %v315_v55 }
  0xa1   : > { %499 = vpow2.f32 %v316_v56 }
  0xa2   : > { %501 = vpow2.f32 %v318_v57 }
  0xab   : > { %v500_v58 = vpop.eup %499 }
  0xac   : > { %v502_v59 = vpop.eup %501  ;;  %v320_v60 = vadd.f32 1.0, %v500_v58 }
  0xad   : > { %v321_v61 = vadd.f32 1.0, %v502_v59 }
  0xae   : > { %503 = vrcp.f32 %v320_v60 }
  0xaf   : > { %505 = vrcp.f32 %v321_v61 }
  0xb8   : > { %v504_v62 = vpop.eup %503 }
  0xb9   : > { %v506_v63 = vpop.eup %505  ;;  %v324_v0 = vmul.f32 %v504_v62, %v312_v52 }
  0xba   : > { %v325_v1 = vmul.f32 %v506_v63, %v313_v53 }
  0xbb   : > { %326 = vst [vmem:[%s188_s11] sm:$0xff] %v324_v0 }
  0xbc   : > { %327 = vst [vmem:[%s188_s11 + $0x8] sm:$0xff] %v325_v1 }
  0xbd   : > { %520 = shalt.err (!%p517_p5)
}
  0xbe   : > { %s521_s30 = scalar_lea.hbm %s683_s23, 256  ;;  %s525_s6 = scalar_lea.hbm %s733_s3, 512 }
  0xbf   : > { %p522_p6 = scmp.ne.s32.totalorder %s683_s23, %s521_s30  ;;  %p526_p10 = scmp.lt.u32.totalorder %s683_s23, %s733_s3 }
  0xc0   : > { %p527_p11 = scmp.lt.u32.totalorder %s525_s6, %s521_s30  ;;  %p529_p13 = scmp.lt.u32.totalorder %s521_s30, %s683_s23 }
  0xc1   : > { %p523_p7 = pnand %p522_p6, %p652_p4 }
  0xc2   : > { %p528_p12 = por %p527_p11, %p526_p10 }
  0xc3   : > { %p524_p9 = pneg %p523_p7 }
  0xc4   : > { %p530_p0 = por %p529_p13, %p528_p12 }
  0xc6   : > { %p531_p1 = pnand %p530_p0, %p524_p9 }
  0xc8   : > { %534 = shalt.err (!%p531_p1)
}
  0xc9   : > { %436 = dma.vmem_to_hbm [thread:$0]  (%p652_p4), %s685_s18, 256, %s683_s23, %s329_s26  }
  0xca PF: > { %p442_p2 = scmp.ge.s32.totalorder %s585_s17, 2  ;;  %s357_s9 = sand.u32 1, %s565_s12  }
  0xcb   : > { %s358_s10 = scalar_lea.sflag [#allocation3], %s357_s9 }
  0xcc   : > { %p439_p3 = pnand %p442_p2, %p659_p8 }
  0xce   : > { %560 = dma.done.wait (!%p439_p3), %s358_s10, 256  }
  0xcf   : > { %562 = vsyncadd (!%p439_p3), %s358_s10, 4294967040  ;;  %s16_s17 = sadd.s32 1, %s585_s17   ;;  %s736_s12 = smov %s569_s13 }
  0xd0   : > { %p13_p5 = scmp.ge.s32.totalorder %s16_s17, 4   ;;  %s737_s13 = smov %s573_s14 }
  0xd1   : > { %s738_s14 = smov %s665_s25  ;;  %s739_s15 = smov %s581_s16 }
  0xd2   : > { %s740_s16 = smov %s742_s20  ;;  %15 = sbr.rel (!%p13_p5) target bundleno = 4 (0x4), region = 67 }
  0xd9   :  { %363 = vsyncpa [#allocation3], 1 }
  0xda   :  { %365 = vsyncpa [#allocation3 + $0x1], 1 }

</bundles_post_ra>
